<compile_context>
chip_gen: v6e
topology: v6e:2x2x1
jax: 0.10.0
libtpu: 0.0.40
codegen_flags: <defaults>
</compile_context>

<pallas_src>
import jax
import jax.numpy as jnp
from jax.experimental import pallas as pl
from jax.experimental.pallas import tpu as pltpu


# ---- problem dims (from the PyTorch module) ---------------------------------
IN_F, HID1, HID2, OUT_F = 4, 10, 5, 3

# ---- flat parameter vector layout (f32, lives in SMEM) -----------------------
W1_OFF = 0                          # W1 [IN_F, HID1] row-major        (40)
B1_OFF = W1_OFF + IN_F * HID1       # b1 [HID1]                        (10)
W23_OFF = B1_OFF + HID1             # W23 = W2 @ W3, [HID1, OUT_F]     (30)
B23_OFF = W23_OFF + HID1 * OUT_F    # b23 = b2 @ W3 + b3, [OUT_F]      ( 3)
N_PARAMS = B23_OFF + OUT_F          # 83 scalars total


def mlp_kernel(p_ref, x_ref, o_ref):
    """One batch tile, feature-major: x [IN_F, TBS, 128] -> out [OUT_F, TBS, 128].

    Weights/biases are scalars read from SMEM (p_ref, f32[83]); all vector work
    is dense [TBS, 128] FMAs on the VPU.
    """
    # Load the IN_F dense feature planes once (each is [TBS, 128]).
    x = [x_ref[k] for k in range(IN_F)]

    # Layer 1: h_j = relu(sum_k W1[k,j] * x_k + b1[j]), fully unrolled.
    h = []
    for j in range(HID1):
        acc = x[0] * p_ref[W1_OFF + 0 * HID1 + j]
        for k in range(1, IN_F):
            acc = acc + x[k] * p_ref[W1_OFF + k * HID1 + j]
        acc = acc + p_ref[B1_OFF + j]
        h.append(jnp.maximum(acc, 0.0))          # F.relu

    # Fused layers 2+3: y_j = sum_k W23[k,j] * h_k + b23[j].
    for j in range(OUT_F):
        acc = h[0] * p_ref[W23_OFF + 0 * OUT_F + j]
        for k in range(1, HID1):
            acc = acc + h[k] * p_ref[W23_OFF + k * OUT_F + j]
        acc = acc + p_ref[B23_OFF + j]
        o_ref[j] = acc.astype(o_ref.dtype)       # full-lane, unmasked store


def _round_up(n, m):
    return ((n + m - 1) // m) * m


def _pack_params(params):
    """Fuse layers 2+3 and flatten everything into one f32[83] vector."""
    w1, b1, w2, b2, w3, b3 = params
    w23 = w2 @ w3                        # [10, 3]  exact fusion (no nonlinearity)
    b23 = b2 @ w3 + b3                   # [1, 3]
    return jnp.concatenate(
        [w1.reshape(-1), b1.reshape(-1), w23.reshape(-1), b23.reshape(-1)]
    ).astype(jnp.float32)


def cnn_forward(x, params, *, tb=16384):
    """Forward pass of the `CNN` module. x: [B, 4] f32 -> [B, 3] f32.

    tb = batch rows per grid step; forced to a multiple of 1024 so the
    per-feature tile is a dense (TBS, 128) sublane/lane block.
    """
    pvec = _pack_params(params)          # f32[83] -> SMEM
    B = x.shape[0]

    tb = max(1024, min(tb, _round_up(B, 1024)))
    tb = _round_up(tb, 1024)
    b_pad = _round_up(B, tb)
    nb = b_pad // 128                    # lane-groups of 128 batch rows
    tbs = tb // 128                      # sublane-rows per tile (multiple of 8)

    # Lane-dense, feature-major layout: [B,4] -> [4, b_pad/128, 128].
    # pad + transpose + reshape fuse into a single XLA copy feeding the kernel.
    x_t = jnp.pad(x, ((0, b_pad - B), (0, 0))).T.reshape(IN_F, nb, 128)

    out_t = pl.pallas_call(
        mlp_kernel,
        out_shape=jax.ShapeDtypeStruct((OUT_F, nb, 128), jnp.float32),
        grid=(b_pad // tb,),
        in_specs=[
            # Packed parameters: 83 f32 scalars, whole vector in SMEM.
            pl.BlockSpec(memory_space=pltpu.MemorySpace.SMEM),
            # Activations: tiled over batch, auto double-buffered by Pallas.
            pl.BlockSpec((IN_F, tbs, 128), lambda i: (0, i, 0)),
        ],
        out_specs=pl.BlockSpec((OUT_F, tbs, 128), lambda i: (0, i, 0)),
        compiler_params=pltpu.CompilerParams(
            dimension_semantics=("parallel",),   # shard batch across TCs on v7x
        ),
    )(pvec, x_t)

    # Back to the nn.Linear layout [B, 3] (fused reshape/transpose/slice).
    out = out_t.reshape(OUT_F, b_pad).T
    return out[:B]


def init_params(key):
    """Deterministic init mimicking PyTorch nn.Linear (uniform +-1/sqrt(fan_in)).

    Weights are stored pre-transposed as [F_in, F_out]; biases as [1, F_out].
    """
    dims = [(IN_F, HID1), (HID1, HID2), (HID2, OUT_F)]
    params = []
    for (fan_in, fan_out) in dims:
        key, kw, kb = jax.random.split(key, 3)
        bound = 1.0 / jnp.sqrt(jnp.float32(fan_in))
        w = jax.random.uniform(kw, (fan_in, fan_out), jnp.float32, -bound, bound)
        b = jax.random.uniform(kb, (1, fan_out), jnp.float32, -bound, bound)
        params += [w, b]
    return tuple(params)


def reference_forward(x, params):
    """Plain-JAX reference of the *unfused* 3-layer module."""
    w1, b1, w2, b2, w3, b3 = params
    h = jnp.maximum(x @ w1 + b1, 0.0)
    h = h @ w2 + b2
    return h @ w3 + b3


if __name__ == "__main__":
    key = jax.random.PRNGKey(0)
    key, kx = jax.random.split(key)

    B = 4096                                           # small demo batch
    x = jax.random.normal(kx, (B, IN_F), jnp.float32)  # [batch, in_features=4]
    params = init_params(key)

    out = cnn_forward(x, params, tb=1024)              # 4 pipelined grid steps
    out = jax.block_until_ready(out)

    ref = reference_forward(x, params)
    assert out.shape == (B, OUT_F), out.shape
    assert jnp.allclose(out, ref, atol=1e-5, rtol=1e-5), "mismatch vs JAX reference"

    print("KERNEL_OK")
</pallas_src>

<mosaic_0001>
module attributes {stable_mosaic.version = 11 : i64} {
  func.func @mlp_kernel(%arg0: i32, %arg1: memref<83xf32, #tpu.memory_space<smem>>, %arg2: memref<4x8x128xf32, #tpu.memory_space<vmem>>, %arg3: memref<3x8x128xf32, #tpu.memory_space<vmem>>) attributes {dimension_semantics = [#tpu.dimension_semantics<parallel>], iteration_bounds = array<i64: 4>, scalar_prefetch = 0 : i64, scratch_operands = 0 : i64, tpu.core_type = #tpu.core_type<tc>, window_params = [{transform_indices = @transform_0, window_bounds = array<i64: 83>}, {transform_indices = @transform_1, window_bounds = array<i64: 4, 8, 128>}, {transform_indices = @transform_2, window_bounds = array<i64: 3, 8, 128>}]} {
    %c0 = arith.constant 0 : index
    %c0_0 = arith.constant 0 : index
    %c0_1 = arith.constant 0 : index
    %0 = vector.load %arg2[%c0, %c0_0, %c0_1] : memref<4x8x128xf32, #tpu.memory_space<vmem>>, vector<1x8x128xf32>
    %1 = vector.shape_cast %0 : vector<1x8x128xf32> to vector<8x128xf32>
    %c1 = arith.constant 1 : index
    %c0_2 = arith.constant 0 : index
    %c0_3 = arith.constant 0 : index
    %2 = vector.load %arg2[%c1, %c0_2, %c0_3] : memref<4x8x128xf32, #tpu.memory_space<vmem>>, vector<1x8x128xf32>
    %3 = vector.shape_cast %2 : vector<1x8x128xf32> to vector<8x128xf32>
    %c2 = arith.constant 2 : index
    %c0_4 = arith.constant 0 : index
    %c0_5 = arith.constant 0 : index
    %4 = vector.load %arg2[%c2, %c0_4, %c0_5] : memref<4x8x128xf32, #tpu.memory_space<vmem>>, vector<1x8x128xf32>
    %5 = vector.shape_cast %4 : vector<1x8x128xf32> to vector<8x128xf32>
    %c3 = arith.constant 3 : index
    %c0_6 = arith.constant 0 : index
    %c0_7 = arith.constant 0 : index
    %6 = vector.load %arg2[%c3, %c0_6, %c0_7] : memref<4x8x128xf32, #tpu.memory_space<vmem>>, vector<1x8x128xf32>
    %7 = vector.shape_cast %6 : vector<1x8x128xf32> to vector<8x128xf32>
    %c0_8 = arith.constant 0 : index
    %8 = memref.load %arg1[%c0_8] : memref<83xf32, #tpu.memory_space<smem>>
    %9 = vector.broadcast %8 : f32 to vector<8x128xf32>
    %10 = arith.mulf %1, %9 : vector<8x128xf32>
    %c10 = arith.constant 10 : index
    %11 = memref.load %arg1[%c10] : memref<83xf32, #tpu.memory_space<smem>>
    %12 = vector.broadcast %11 : f32 to vector<8x128xf32>
    %13 = arith.mulf %3, %12 : vector<8x128xf32>
    %14 = arith.addf %10, %13 : vector<8x128xf32>
    %c20 = arith.constant 20 : index
    %15 = memref.load %arg1[%c20] : memref<83xf32, #tpu.memory_space<smem>>
    %16 = vector.broadcast %15 : f32 to vector<8x128xf32>
    %17 = arith.mulf %5, %16 : vector<8x128xf32>
    %18 = arith.addf %14, %17 : vector<8x128xf32>
    %c30 = arith.constant 30 : index
    %19 = memref.load %arg1[%c30] : memref<83xf32, #tpu.memory_space<smem>>
    %20 = vector.broadcast %19 : f32 to vector<8x128xf32>
    %21 = arith.mulf %7, %20 : vector<8x128xf32>
    %22 = arith.addf %18, %21 : vector<8x128xf32>
    %c40 = arith.constant 40 : index
    %23 = memref.load %arg1[%c40] : memref<83xf32, #tpu.memory_space<smem>>
    %24 = vector.broadcast %23 : f32 to vector<8x128xf32>
    %25 = arith.addf %22, %24 : vector<8x128xf32>
    %cst = arith.constant 0.000000e+00 : f32
    %26 = vector.broadcast %cst : f32 to vector<8x128xf32>
    %27 = arith.maximumf %25, %26 : vector<8x128xf32>
    %c1_9 = arith.constant 1 : index
    %28 = memref.load %arg1[%c1_9] : memref<83xf32, #tpu.memory_space<smem>>
    %29 = vector.broadcast %28 : f32 to vector<8x128xf32>
    %30 = arith.mulf %1, %29 : vector<8x128xf32>
    %c11 = arith.constant 11 : index
    %31 = memref.load %arg1[%c11] : memref<83xf32, #tpu.memory_space<smem>>
    %32 = vector.broadcast %31 : f32 to vector<8x128xf32>
    %33 = arith.mulf %3, %32 : vector<8x128xf32>
    %34 = arith.addf %30, %33 : vector<8x128xf32>
    %c21 = arith.constant 21 : index
    %35 = memref.load %arg1[%c21] : memref<83xf32, #tpu.memory_space<smem>>
    %36 = vector.broadcast %35 : f32 to vector<8x128xf32>
    %37 = arith.mulf %5, %36 : vector<8x128xf32>
    %38 = arith.addf %34, %37 : vector<8x128xf32>
    %c31 = arith.constant 31 : index
    %39 = memref.load %arg1[%c31] : memref<83xf32, #tpu.memory_space<smem>>
    %40 = vector.broadcast %39 : f32 to vector<8x128xf32>
    %41 = arith.mulf %7, %40 : vector<8x128xf32>
    %42 = arith.addf %38, %41 : vector<8x128xf32>
    %c41 = arith.constant 41 : index
    %43 = memref.load %arg1[%c41] : memref<83xf32, #tpu.memory_space<smem>>
    %44 = vector.broadcast %43 : f32 to vector<8x128xf32>
    %45 = arith.addf %42, %44 : vector<8x128xf32>
    %cst_10 = arith.constant 0.000000e+00 : f32
    %46 = vector.broadcast %cst_10 : f32 to vector<8x128xf32>
    %47 = arith.maximumf %45, %46 : vector<8x128xf32>
    %c2_11 = arith.constant 2 : index
    %48 = memref.load %arg1[%c2_11] : memref<83xf32, #tpu.memory_space<smem>>
    %49 = vector.broadcast %48 : f32 to vector<8x128xf32>
    %50 = arith.mulf %1, %49 : vector<8x128xf32>
    %c12 = arith.constant 12 : index
    %51 = memref.load %arg1[%c12] : memref<83xf32, #tpu.memory_space<smem>>
    %52 = vector.broadcast %51 : f32 to vector<8x128xf32>
    %53 = arith.mulf %3, %52 : vector<8x128xf32>
    %54 = arith.addf %50, %53 : vector<8x128xf32>
    %c22 = arith.constant 22 : index
    %55 = memref.load %arg1[%c22] : memref<83xf32, #tpu.memory_space<smem>>
    %56 = vector.broadcast %55 : f32 to vector<8x128xf32>
    %57 = arith.mulf %5, %56 : vector<8x128xf32>
    %58 = arith.addf %54, %57 : vector<8x128xf32>
    %c32 = arith.constant 32 : index
    %59 = memref.load %arg1[%c32] : memref<83xf32, #tpu.memory_space<smem>>
    %60 = vector.broadcast %59 : f32 to vector<8x128xf32>
    %61 = arith.mulf %7, %60 : vector<8x128xf32>
    %62 = arith.addf %58, %61 : vector<8x128xf32>
    %c42 = arith.constant 42 : index
    %63 = memref.load %arg1[%c42] : memref<83xf32, #tpu.memory_space<smem>>
    %64 = vector.broadcast %63 : f32 to vector<8x128xf32>
    %65 = arith.addf %62, %64 : vector<8x128xf32>
    %cst_12 = arith.constant 0.000000e+00 : f32
    %66 = vector.broadcast %cst_12 : f32 to vector<8x128xf32>
    %67 = arith.maximumf %65, %66 : vector<8x128xf32>
    %c3_13 = arith.constant 3 : index
    %68 = memref.load %arg1[%c3_13] : memref<83xf32, #tpu.memory_space<smem>>
    %69 = vector.broadcast %68 : f32 to vector<8x128xf32>
    %70 = arith.mulf %1, %69 : vector<8x128xf32>
    %c13 = arith.constant 13 : index
    %71 = memref.load %arg1[%c13] : memref<83xf32, #tpu.memory_space<smem>>
    %72 = vector.broadcast %71 : f32 to vector<8x128xf32>
    %73 = arith.mulf %3, %72 : vector<8x128xf32>
    %74 = arith.addf %70, %73 : vector<8x128xf32>
    %c23 = arith.constant 23 : index
    %75 = memref.load %arg1[%c23] : memref<83xf32, #tpu.memory_space<smem>>
    %76 = vector.broadcast %75 : f32 to vector<8x128xf32>
    %77 = arith.mulf %5, %76 : vector<8x128xf32>
    %78 = arith.addf %74, %77 : vector<8x128xf32>
    %c33 = arith.constant 33 : index
    %79 = memref.load %arg1[%c33] : memref<83xf32, #tpu.memory_space<smem>>
    %80 = vector.broadcast %79 : f32 to vector<8x128xf32>
    %81 = arith.mulf %7, %80 : vector<8x128xf32>
    %82 = arith.addf %78, %81 : vector<8x128xf32>
    %c43 = arith.constant 43 : index
    %83 = memref.load %arg1[%c43] : memref<83xf32, #tpu.memory_space<smem>>
    %84 = vector.broadcast %83 : f32 to vector<8x128xf32>
    %85 = arith.addf %82, %84 : vector<8x128xf32>
    %cst_14 = arith.constant 0.000000e+00 : f32
    %86 = vector.broadcast %cst_14 : f32 to vector<8x128xf32>
    %87 = arith.maximumf %85, %86 : vector<8x128xf32>
    %c4 = arith.constant 4 : index
    %88 = memref.load %arg1[%c4] : memref<83xf32, #tpu.memory_space<smem>>
    %89 = vector.broadcast %88 : f32 to vector<8x128xf32>
    %90 = arith.mulf %1, %89 : vector<8x128xf32>
    %c14 = arith.constant 14 : index
    %91 = memref.load %arg1[%c14] : memref<83xf32, #tpu.memory_space<smem>>
    %92 = vector.broadcast %91 : f32 to vector<8x128xf32>
    %93 = arith.mulf %3, %92 : vector<8x128xf32>
    %94 = arith.addf %90, %93 : vector<8x128xf32>
    %c24 = arith.constant 24 : index
    %95 = memref.load %arg1[%c24] : memref<83xf32, #tpu.memory_space<smem>>
    %96 = vector.broadcast %95 : f32 to vector<8x128xf32>
    %97 = arith.mulf %5, %96 : vector<8x128xf32>
    %98 = arith.addf %94, %97 : vector<8x128xf32>
    %c34 = arith.constant 34 : index
    %99 = memref.load %arg1[%c34] : memref<83xf32, #tpu.memory_space<smem>>
    %100 = vector.broadcast %99 : f32 to vector<8x128xf32>
    %101 = arith.mulf %7, %100 : vector<8x128xf32>
    %102 = arith.addf %98, %101 : vector<8x128xf32>
    %c44 = arith.constant 44 : index
    %103 = memref.load %arg1[%c44] : memref<83xf32, #tpu.memory_space<smem>>
    %104 = vector.broadcast %103 : f32 to vector<8x128xf32>
    %105 = arith.addf %102, %104 : vector<8x128xf32>
    %cst_15 = arith.constant 0.000000e+00 : f32
    %106 = vector.broadcast %cst_15 : f32 to vector<8x128xf32>
    %107 = arith.maximumf %105, %106 : vector<8x128xf32>
    %c5 = arith.constant 5 : index
    %108 = memref.load %arg1[%c5] : memref<83xf32, #tpu.memory_space<smem>>
    %109 = vector.broadcast %108 : f32 to vector<8x128xf32>
    %110 = arith.mulf %1, %109 : vector<8x128xf32>
    %c15 = arith.constant 15 : index
    %111 = memref.load %arg1[%c15] : memref<83xf32, #tpu.memory_space<smem>>
    %112 = vector.broadcast %111 : f32 to vector<8x128xf32>
    %113 = arith.mulf %3, %112 : vector<8x128xf32>
    %114 = arith.addf %110, %113 : vector<8x128xf32>
    %c25 = arith.constant 25 : index
    %115 = memref.load %arg1[%c25] : memref<83xf32, #tpu.memory_space<smem>>
    %116 = vector.broadcast %115 : f32 to vector<8x128xf32>
    %117 = arith.mulf %5, %116 : vector<8x128xf32>
    %118 = arith.addf %114, %117 : vector<8x128xf32>
    %c35 = arith.constant 35 : index
    %119 = memref.load %arg1[%c35] : memref<83xf32, #tpu.memory_space<smem>>
    %120 = vector.broadcast %119 : f32 to vector<8x128xf32>
    %121 = arith.mulf %7, %120 : vector<8x128xf32>
    %122 = arith.addf %118, %121 : vector<8x128xf32>
    %c45 = arith.constant 45 : index
    %123 = memref.load %arg1[%c45] : memref<83xf32, #tpu.memory_space<smem>>
    %124 = vector.broadcast %123 : f32 to vector<8x128xf32>
    %125 = arith.addf %122, %124 : vector<8x128xf32>
    %cst_16 = arith.constant 0.000000e+00 : f32
    %126 = vector.broadcast %cst_16 : f32 to vector<8x128xf32>
    %127 = arith.maximumf %125, %126 : vector<8x128xf32>
    %c6 = arith.constant 6 : index
    %128 = memref.load %arg1[%c6] : memref<83xf32, #tpu.memory_space<smem>>
    %129 = vector.broadcast %128 : f32 to vector<8x128xf32>
    %130 = arith.mulf %1, %129 : vector<8x128xf32>
    %c16 = arith.constant 16 : index
    %131 = memref.load %arg1[%c16] : memref<83xf32, #tpu.memory_space<smem>>
    %132 = vector.broadcast %131 : f32 to vector<8x128xf32>
    %133 = arith.mulf %3, %132 : vector<8x128xf32>
    %134 = arith.addf %130, %133 : vector<8x128xf32>
    %c26 = arith.constant 26 : index
    %135 = memref.load %arg1[%c26] : memref<83xf32, #tpu.memory_space<smem>>
    %136 = vector.broadcast %135 : f32 to vector<8x128xf32>
    %137 = arith.mulf %5, %136 : vector<8x128xf32>
    %138 = arith.addf %134, %137 : vector<8x128xf32>
    %c36 = arith.constant 36 : index
    %139 = memref.load %arg1[%c36] : memref<83xf32, #tpu.memory_space<smem>>
    %140 = vector.broadcast %139 : f32 to vector<8x128xf32>
    %141 = arith.mulf %7, %140 : vector<8x128xf32>
    %142 = arith.addf %138, %141 : vector<8x128xf32>
    %c46 = arith.constant 46 : index
    %143 = memref.load %arg1[%c46] : memref<83xf32, #tpu.memory_space<smem>>
    %144 = vector.broadcast %143 : f32 to vector<8x128xf32>
    %145 = arith.addf %142, %144 : vector<8x128xf32>
    %cst_17 = arith.constant 0.000000e+00 : f32
    %146 = vector.broadcast %cst_17 : f32 to vector<8x128xf32>
    %147 = arith.maximumf %145, %146 : vector<8x128xf32>
    %c7 = arith.constant 7 : index
    %148 = memref.load %arg1[%c7] : memref<83xf32, #tpu.memory_space<smem>>
    %149 = vector.broadcast %148 : f32 to vector<8x128xf32>
    %150 = arith.mulf %1, %149 : vector<8x128xf32>
    %c17 = arith.constant 17 : index
    %151 = memref.load %arg1[%c17] : memref<83xf32, #tpu.memory_space<smem>>
    %152 = vector.broadcast %151 : f32 to vector<8x128xf32>
    %153 = arith.mulf %3, %152 : vector<8x128xf32>
    %154 = arith.addf %150, %153 : vector<8x128xf32>
    %c27 = arith.constant 27 : index
    %155 = memref.load %arg1[%c27] : memref<83xf32, #tpu.memory_space<smem>>
    %156 = vector.broadcast %155 : f32 to vector<8x128xf32>
    %157 = arith.mulf %5, %156 : vector<8x128xf32>
    %158 = arith.addf %154, %157 : vector<8x128xf32>
    %c37 = arith.constant 37 : index
    %159 = memref.load %arg1[%c37] : memref<83xf32, #tpu.memory_space<smem>>
    %160 = vector.broadcast %159 : f32 to vector<8x128xf32>
    %161 = arith.mulf %7, %160 : vector<8x128xf32>
    %162 = arith.addf %158, %161 : vector<8x128xf32>
    %c47 = arith.constant 47 : index
    %163 = memref.load %arg1[%c47] : memref<83xf32, #tpu.memory_space<smem>>
    %164 = vector.broadcast %163 : f32 to vector<8x128xf32>
    %165 = arith.addf %162, %164 : vector<8x128xf32>
    %cst_18 = arith.constant 0.000000e+00 : f32
    %166 = vector.broadcast %cst_18 : f32 to vector<8x128xf32>
    %167 = arith.maximumf %165, %166 : vector<8x128xf32>
    %c8 = arith.constant 8 : index
    %168 = memref.load %arg1[%c8] : memref<83xf32, #tpu.memory_space<smem>>
    %169 = vector.broadcast %168 : f32 to vector<8x128xf32>
    %170 = arith.mulf %1, %169 : vector<8x128xf32>
    %c18 = arith.constant 18 : index
    %171 = memref.load %arg1[%c18] : memref<83xf32, #tpu.memory_space<smem>>
    %172 = vector.broadcast %171 : f32 to vector<8x128xf32>
    %173 = arith.mulf %3, %172 : vector<8x128xf32>
    %174 = arith.addf %170, %173 : vector<8x128xf32>
    %c28 = arith.constant 28 : index
    %175 = memref.load %arg1[%c28] : memref<83xf32, #tpu.memory_space<smem>>
    %176 = vector.broadcast %175 : f32 to vector<8x128xf32>
    %177 = arith.mulf %5, %176 : vector<8x128xf32>
    %178 = arith.addf %174, %177 : vector<8x128xf32>
    %c38 = arith.constant 38 : index
    %179 = memref.load %arg1[%c38] : memref<83xf32, #tpu.memory_space<smem>>
    %180 = vector.broadcast %179 : f32 to vector<8x128xf32>
    %181 = arith.mulf %7, %180 : vector<8x128xf32>
    %182 = arith.addf %178, %181 : vector<8x128xf32>
    %c48 = arith.constant 48 : index
    %183 = memref.load %arg1[%c48] : memref<83xf32, #tpu.memory_space<smem>>
    %184 = vector.broadcast %183 : f32 to vector<8x128xf32>
    %185 = arith.addf %182, %184 : vector<8x128xf32>
    %cst_19 = arith.constant 0.000000e+00 : f32
    %186 = vector.broadcast %cst_19 : f32 to vector<8x128xf32>
    %187 = arith.maximumf %185, %186 : vector<8x128xf32>
    %c9 = arith.constant 9 : index
    %188 = memref.load %arg1[%c9] : memref<83xf32, #tpu.memory_space<smem>>
    %189 = vector.broadcast %188 : f32 to vector<8x128xf32>
    %190 = arith.mulf %1, %189 : vector<8x128xf32>
    %c19 = arith.constant 19 : index
    %191 = memref.load %arg1[%c19] : memref<83xf32, #tpu.memory_space<smem>>
    %192 = vector.broadcast %191 : f32 to vector<8x128xf32>
    %193 = arith.mulf %3, %192 : vector<8x128xf32>
    %194 = arith.addf %190, %193 : vector<8x128xf32>
    %c29 = arith.constant 29 : index
    %195 = memref.load %arg1[%c29] : memref<83xf32, #tpu.memory_space<smem>>
    %196 = vector.broadcast %195 : f32 to vector<8x128xf32>
    %197 = arith.mulf %5, %196 : vector<8x128xf32>
    %198 = arith.addf %194, %197 : vector<8x128xf32>
    %c39 = arith.constant 39 : index
    %199 = memref.load %arg1[%c39] : memref<83xf32, #tpu.memory_space<smem>>
    %200 = vector.broadcast %199 : f32 to vector<8x128xf32>
    %201 = arith.mulf %7, %200 : vector<8x128xf32>
    %202 = arith.addf %198, %201 : vector<8x128xf32>
    %c49 = arith.constant 49 : index
    %203 = memref.load %arg1[%c49] : memref<83xf32, #tpu.memory_space<smem>>
    %204 = vector.broadcast %203 : f32 to vector<8x128xf32>
    %205 = arith.addf %202, %204 : vector<8x128xf32>
    %cst_20 = arith.constant 0.000000e+00 : f32
    %206 = vector.broadcast %cst_20 : f32 to vector<8x128xf32>
    %207 = arith.maximumf %205, %206 : vector<8x128xf32>
    %c50 = arith.constant 50 : index
    %208 = memref.load %arg1[%c50] : memref<83xf32, #tpu.memory_space<smem>>
    %209 = vector.broadcast %208 : f32 to vector<8x128xf32>
    %210 = arith.mulf %27, %209 : vector<8x128xf32>
    %c53 = arith.constant 53 : index
    %211 = memref.load %arg1[%c53] : memref<83xf32, #tpu.memory_space<smem>>
    %212 = vector.broadcast %211 : f32 to vector<8x128xf32>
    %213 = arith.mulf %47, %212 : vector<8x128xf32>
    %214 = arith.addf %210, %213 : vector<8x128xf32>
    %c56 = arith.constant 56 : index
    %215 = memref.load %arg1[%c56] : memref<83xf32, #tpu.memory_space<smem>>
    %216 = vector.broadcast %215 : f32 to vector<8x128xf32>
    %217 = arith.mulf %67, %216 : vector<8x128xf32>
    %218 = arith.addf %214, %217 : vector<8x128xf32>
    %c59 = arith.constant 59 : index
    %219 = memref.load %arg1[%c59] : memref<83xf32, #tpu.memory_space<smem>>
    %220 = vector.broadcast %219 : f32 to vector<8x128xf32>
    %221 = arith.mulf %87, %220 : vector<8x128xf32>
    %222 = arith.addf %218, %221 : vector<8x128xf32>
    %c62 = arith.constant 62 : index
    %223 = memref.load %arg1[%c62] : memref<83xf32, #tpu.memory_space<smem>>
    %224 = vector.broadcast %223 : f32 to vector<8x128xf32>
    %225 = arith.mulf %107, %224 : vector<8x128xf32>
    %226 = arith.addf %222, %225 : vector<8x128xf32>
    %c65 = arith.constant 65 : index
    %227 = memref.load %arg1[%c65] : memref<83xf32, #tpu.memory_space<smem>>
    %228 = vector.broadcast %227 : f32 to vector<8x128xf32>
    %229 = arith.mulf %127, %228 : vector<8x128xf32>
    %230 = arith.addf %226, %229 : vector<8x128xf32>
    %c68 = arith.constant 68 : index
    %231 = memref.load %arg1[%c68] : memref<83xf32, #tpu.memory_space<smem>>
    %232 = vector.broadcast %231 : f32 to vector<8x128xf32>
    %233 = arith.mulf %147, %232 : vector<8x128xf32>
    %234 = arith.addf %230, %233 : vector<8x128xf32>
    %c71 = arith.constant 71 : index
    %235 = memref.load %arg1[%c71] : memref<83xf32, #tpu.memory_space<smem>>
    %236 = vector.broadcast %235 : f32 to vector<8x128xf32>
    %237 = arith.mulf %167, %236 : vector<8x128xf32>
    %238 = arith.addf %234, %237 : vector<8x128xf32>
    %c74 = arith.constant 74 : index
    %239 = memref.load %arg1[%c74] : memref<83xf32, #tpu.memory_space<smem>>
    %240 = vector.broadcast %239 : f32 to vector<8x128xf32>
    %241 = arith.mulf %187, %240 : vector<8x128xf32>
    %242 = arith.addf %238, %241 : vector<8x128xf32>
    %c77 = arith.constant 77 : index
    %243 = memref.load %arg1[%c77] : memref<83xf32, #tpu.memory_space<smem>>
    %244 = vector.broadcast %243 : f32 to vector<8x128xf32>
    %245 = arith.mulf %207, %244 : vector<8x128xf32>
    %246 = arith.addf %242, %245 : vector<8x128xf32>
    %c80 = arith.constant 80 : index
    %247 = memref.load %arg1[%c80] : memref<83xf32, #tpu.memory_space<smem>>
    %248 = vector.broadcast %247 : f32 to vector<8x128xf32>
    %249 = arith.addf %246, %248 : vector<8x128xf32>
    %c0_21 = arith.constant 0 : index
    %c0_22 = arith.constant 0 : index
    %c0_23 = arith.constant 0 : index
    %250 = vector.load %arg3[%c0_21, %c0_22, %c0_23] : memref<3x8x128xf32, #tpu.memory_space<vmem>>, vector<1x8x128xf32>
    %251 = vector.shape_cast %250 : vector<1x8x128xf32> to vector<8x128xf32>
    %252 = vector.shape_cast %249 : vector<8x128xf32> to vector<1x8x128xf32>
    tpu.vector_store %arg3[%c0_21, %c0_22, %c0_23], %252 {strides = array<i32>} : memref<3x8x128xf32, #tpu.memory_space<vmem>>, vector<1x8x128xf32>,
    %c51 = arith.constant 51 : index
    %253 = memref.load %arg1[%c51] : memref<83xf32, #tpu.memory_space<smem>>
    %254 = vector.broadcast %253 : f32 to vector<8x128xf32>
    %255 = arith.mulf %27, %254 : vector<8x128xf32>
    %c54 = arith.constant 54 : index
    %256 = memref.load %arg1[%c54] : memref<83xf32, #tpu.memory_space<smem>>
    %257 = vector.broadcast %256 : f32 to vector<8x128xf32>
    %258 = arith.mulf %47, %257 : vector<8x128xf32>
    %259 = arith.addf %255, %258 : vector<8x128xf32>
    %c57 = arith.constant 57 : index
    %260 = memref.load %arg1[%c57] : memref<83xf32, #tpu.memory_space<smem>>
    %261 = vector.broadcast %260 : f32 to vector<8x128xf32>
    %262 = arith.mulf %67, %261 : vector<8x128xf32>
    %263 = arith.addf %259, %262 : vector<8x128xf32>
    %c60 = arith.constant 60 : index
    %264 = memref.load %arg1[%c60] : memref<83xf32, #tpu.memory_space<smem>>
    %265 = vector.broadcast %264 : f32 to vector<8x128xf32>
    %266 = arith.mulf %87, %265 : vector<8x128xf32>
    %267 = arith.addf %263, %266 : vector<8x128xf32>
    %c63 = arith.constant 63 : index
    %268 = memref.load %arg1[%c63] : memref<83xf32, #tpu.memory_space<smem>>
    %269 = vector.broadcast %268 : f32 to vector<8x128xf32>
    %270 = arith.mulf %107, %269 : vector<8x128xf32>
    %271 = arith.addf %267, %270 : vector<8x128xf32>
    %c66 = arith.constant 66 : index
    %272 = memref.load %arg1[%c66] : memref<83xf32, #tpu.memory_space<smem>>
    %273 = vector.broadcast %272 : f32 to vector<8x128xf32>
    %274 = arith.mulf %127, %273 : vector<8x128xf32>
    %275 = arith.addf %271, %274 : vector<8x128xf32>
    %c69 = arith.constant 69 : index
    %276 = memref.load %arg1[%c69] : memref<83xf32, #tpu.memory_space<smem>>
    %277 = vector.broadcast %276 : f32 to vector<8x128xf32>
    %278 = arith.mulf %147, %277 : vector<8x128xf32>
    %279 = arith.addf %275, %278 : vector<8x128xf32>
    %c72 = arith.constant 72 : index
    %280 = memref.load %arg1[%c72] : memref<83xf32, #tpu.memory_space<smem>>
    %281 = vector.broadcast %280 : f32 to vector<8x128xf32>
    %282 = arith.mulf %167, %281 : vector<8x128xf32>
    %283 = arith.addf %279, %282 : vector<8x128xf32>
    %c75 = arith.constant 75 : index
    %284 = memref.load %arg1[%c75] : memref<83xf32, #tpu.memory_space<smem>>
    %285 = vector.broadcast %284 : f32 to vector<8x128xf32>
    %286 = arith.mulf %187, %285 : vector<8x128xf32>
    %287 = arith.addf %283, %286 : vector<8x128xf32>
    %c78 = arith.constant 78 : index
    %288 = memref.load %arg1[%c78] : memref<83xf32, #tpu.memory_space<smem>>
    %289 = vector.broadcast %288 : f32 to vector<8x128xf32>
    %290 = arith.mulf %207, %289 : vector<8x128xf32>
    %291 = arith.addf %287, %290 : vector<8x128xf32>
    %c81 = arith.constant 81 : index
    %292 = memref.load %arg1[%c81] : memref<83xf32, #tpu.memory_space<smem>>
    %293 = vector.broadcast %292 : f32 to vector<8x128xf32>
    %294 = arith.addf %291, %293 : vector<8x128xf32>
    %c1_24 = arith.constant 1 : index
    %c0_25 = arith.constant 0 : index
    %c0_26 = arith.constant 0 : index
    %295 = vector.load %arg3[%c1_24, %c0_25, %c0_26] : memref<3x8x128xf32, #tpu.memory_space<vmem>>, vector<1x8x128xf32>
    %296 = vector.shape_cast %295 : vector<1x8x128xf32> to vector<8x128xf32>
    %297 = vector.shape_cast %294 : vector<8x128xf32> to vector<1x8x128xf32>
    tpu.vector_store %arg3[%c1_24, %c0_25, %c0_26], %297 {strides = array<i32>} : memref<3x8x128xf32, #tpu.memory_space<vmem>>, vector<1x8x128xf32>,
    %c52 = arith.constant 52 : index
    %298 = memref.load %arg1[%c52] : memref<83xf32, #tpu.memory_space<smem>>
    %299 = vector.broadcast %298 : f32 to vector<8x128xf32>
    %300 = arith.mulf %27, %299 : vector<8x128xf32>
    %c55 = arith.constant 55 : index
    %301 = memref.load %arg1[%c55] : memref<83xf32, #tpu.memory_space<smem>>
    %302 = vector.broadcast %301 : f32 to vector<8x128xf32>
    %303 = arith.mulf %47, %302 : vector<8x128xf32>
    %304 = arith.addf %300, %303 : vector<8x128xf32>
    %c58 = arith.constant 58 : index
    %305 = memref.load %arg1[%c58] : memref<83xf32, #tpu.memory_space<smem>>
    %306 = vector.broadcast %305 : f32 to vector<8x128xf32>
    %307 = arith.mulf %67, %306 : vector<8x128xf32>
    %308 = arith.addf %304, %307 : vector<8x128xf32>
    %c61 = arith.constant 61 : index
    %309 = memref.load %arg1[%c61] : memref<83xf32, #tpu.memory_space<smem>>
    %310 = vector.broadcast %309 : f32 to vector<8x128xf32>
    %311 = arith.mulf %87, %310 : vector<8x128xf32>
    %312 = arith.addf %308, %311 : vector<8x128xf32>
    %c64 = arith.constant 64 : index
    %313 = memref.load %arg1[%c64] : memref<83xf32, #tpu.memory_space<smem>>
    %314 = vector.broadcast %313 : f32 to vector<8x128xf32>
    %315 = arith.mulf %107, %314 : vector<8x128xf32>
    %316 = arith.addf %312, %315 : vector<8x128xf32>
    %c67 = arith.constant 67 : index
    %317 = memref.load %arg1[%c67] : memref<83xf32, #tpu.memory_space<smem>>
    %318 = vector.broadcast %317 : f32 to vector<8x128xf32>
    %319 = arith.mulf %127, %318 : vector<8x128xf32>
    %320 = arith.addf %316, %319 : vector<8x128xf32>
    %c70 = arith.constant 70 : index
    %321 = memref.load %arg1[%c70] : memref<83xf32, #tpu.memory_space<smem>>
    %322 = vector.broadcast %321 : f32 to vector<8x128xf32>
    %323 = arith.mulf %147, %322 : vector<8x128xf32>
    %324 = arith.addf %320, %323 : vector<8x128xf32>
    %c73 = arith.constant 73 : index
    %325 = memref.load %arg1[%c73] : memref<83xf32, #tpu.memory_space<smem>>
    %326 = vector.broadcast %325 : f32 to vector<8x128xf32>
    %327 = arith.mulf %167, %326 : vector<8x128xf32>
    %328 = arith.addf %324, %327 : vector<8x128xf32>
    %c76 = arith.constant 76 : index
    %329 = memref.load %arg1[%c76] : memref<83xf32, #tpu.memory_space<smem>>
    %330 = vector.broadcast %329 : f32 to vector<8x128xf32>
    %331 = arith.mulf %187, %330 : vector<8x128xf32>
    %332 = arith.addf %328, %331 : vector<8x128xf32>
    %c79 = arith.constant 79 : index
    %333 = memref.load %arg1[%c79] : memref<83xf32, #tpu.memory_space<smem>>
    %334 = vector.broadcast %333 : f32 to vector<8x128xf32>
    %335 = arith.mulf %207, %334 : vector<8x128xf32>
    %336 = arith.addf %332, %335 : vector<8x128xf32>
    %c82 = arith.constant 82 : index
    %337 = memref.load %arg1[%c82] : memref<83xf32, #tpu.memory_space<smem>>
    %338 = vector.broadcast %337 : f32 to vector<8x128xf32>
    %339 = arith.addf %336, %338 : vector<8x128xf32>
    %c2_27 = arith.constant 2 : index
    %c0_28 = arith.constant 0 : index
    %c0_29 = arith.constant 0 : index
    %340 = vector.load %arg3[%c2_27, %c0_28, %c0_29] : memref<3x8x128xf32, #tpu.memory_space<vmem>>, vector<1x8x128xf32>
    %341 = vector.shape_cast %340 : vector<1x8x128xf32> to vector<8x128xf32>
    %342 = vector.shape_cast %339 : vector<8x128xf32> to vector<1x8x128xf32>
    tpu.vector_store %arg3[%c2_27, %c0_28, %c0_29], %342 {strides = array<i32>} : memref<3x8x128xf32, #tpu.memory_space<vmem>>, vector<1x8x128xf32>,
    return
  }
  func.func @transform_0(%arg0: i32) -> i32 {
    %c0_i32 = arith.constant 0 : i32
    %c0_i32_0 = arith.constant 0 : i32
    return %c0_i32 : i32
  }
  func.func @transform_1(%arg0: i32) -> (i32, i32, i32) {
    %c0_i32 = arith.constant 0 : i32
    %c0_i32_0 = arith.constant 0 : i32
    %c0_i32_1 = arith.constant 0 : i32
    return %c0_i32, %arg0, %c0_i32_0 : i32, i32, i32
  }
  func.func @transform_2(%arg0: i32) -> (i32, i32, i32) {
    %c0_i32 = arith.constant 0 : i32
    %c0_i32_0 = arith.constant 0 : i32
    %c0_i32_1 = arith.constant 0 : i32
    return %c0_i32, %arg0, %c0_i32_0 : i32, i32, i32
  }
}

</mosaic_0001>

<bundles_post_ra>
// kernel: tpu_custom_call.1
= control target key start
LH: loop header
LB: loop body
LE: loop exit
PB: predicated region body
PF: predicated region fallthrough
CT: control target
= control target key end

     0   :  { %s1381_s0 = inlined_call_operand.hbm [shape: f32[83], index: 0, kind: input, shape index: {}]   ;;  %s1382_s1 = inlined_call_operand.hbm [shape: f32[4,32,128], index: 1, kind: input, shape index: {}]   ;;  %s1383_s2 = inlined_call_operand.hbm [shape: f32[3,32,128], index: 2, kind: output, shape index: {}]  }
   0x1   :  { %1390 = sst [smem:[#allocation14_spill]] %s1381_s0 }
   0x2   :  { %1391 = sst [smem:[#allocation15_spill]] %s1382_s1 }
   0x3   :  { %7 = vsyncpa [#allocation5], 0 }
   0x4   :  { %8 = vsyncpa [#allocation3], 0 }
   0x5   :  { %10 = vsyncpa [#allocation3 + $0x1], 0 }
   0x6   :  { %11 = vsyncpa [#allocation4], 0 }
   0x7   :  { %13 = vsyncpa [#allocation4 + $0x1], 0  ;;  %s895_s9 = smov 0   ;;  %s897_s10 = smov 0  }
   0x8   :  { %s899_s11 = smov 0   ;;  %s901_s12 = smov 0  }
   0x9 LB: > { %1392 = sst [smem:[#allocation11_spill]] %s861_s10  ;;  %s916_s13 = sadd.s32 4294967295, %s869_s12   ;;  %s869_s12 = sphi %s901_s12, %s1412_s12   ;;  %s865_s11 = sphi %s899_s11, %s1411_s11   ;;  %s861_s10 = sphi %s897_s10, %s1410_s10   ;;  %s857_s9 = sphi %s895_s9, %s1409_s9  }
   0xa   : > { %1393 = sst [smem:[#allocation12_spill]] %s865_s11  ;;  %s599_s14 = sadd.s32 4294967294, %s869_s12  }
   0xb   : > { %s920_s15 = sadd.s32 1, %s869_s12   ;;  %s47_s16 = sadd.s32 1, %s865_s11 }
   0xc   : > { %s44_s17 = ssub.s32 %s869_s12, %s920_s15  ;;  %p54_p0 = scmp.ne.s32.totalorder %s865_s11, %s861_s10 }
   0xd   : > { %p45_p1 = scmp.eq.s32.totalorder %s44_s17, 0  ;;  %p55_p2 = scmp.eq.s32.totalorder %s869_s12, 0 }
   0xe   : > { %p60_p3 = scmp.ne.s32.totalorder %s861_s10, %s857_s9  ;;  %p1385_p4 = scmp.eq.s32.totalorder %s916_s13, 0 }
   0xf   : > { %s932_s18 = scalar_select %p45_p1, %s865_s11, %s47_s16  }
  0x10   : > { %p934_p5 = por %p55_p2, %p54_p0  ;;  %p940_p6 = por %p1385_p4, %p60_p3 }
  0x11   : > { %1394 = sst [smem:[#allocation13_spill]] %s932_s18  ;;  %p84_p7 = scmp.eq.s32.totalorder %s916_s13, 3 }
  0x12   : > { %s1396_s20 = scalar_select %p940_p6, 1, 0 }
  0x13   : > { %p90_p8 = scmp.eq.s32.totalorder %s599_s14, 3  ;;  %p600_p9 = scmp.ge.s32.totalorder %s869_s12, 1 }
  0x14   : > { %p97_p10 = scmp.lt.s32.totalorder %s869_s12, 5  ;;  %p947_p11 = por %p84_p7, %p54_p0 }
  0x15   : > { %p951_p12 = por %p90_p8, %p60_p3  ;;  %p720_p2 = scmp.lt.s32.totalorder %s869_s12, 4 }
  0x16   : > { %s1397_s21 = scalar_select %p947_p11, 1, 0 }
  0x17   : > { %s1398_s22 = scalar_select %p951_p12, 1, 0 }
  0x18   : > { %p955_p13 = pnand %p600_p9, %p97_p10  ;;  %s119_s24 = sand.u32 1, %s865_s11  }
  0x19   : > { %s604_s25 = sshll.u32 %s869_s12, 7  ;;  %p968_p0 = pnand %p720_p2, %p934_p5 }
  0x1a   : > { %s1399_s23 = scalar_select %p955_p13, 1, 0 }
  0x1b   : > { %p707_p1 = pneg %p955_p13  ;;  %s603_s27 = sshll.u32 %s119_s24, 5 }
  0x1c   : > { %s871_s28 = smov [#allocation2]   ;;  %s1401_s0 = sld [smem:[#allocation14_spill]] }
  0x1d   : > { %p708_p6 = pnand %p707_p1, %p1385_p4  ;;  %s1402_s1 = sld [smem:[#allocation15_spill]] }
  0x1e   : > { %s123_s6 = scalar_lea.vmem [#allocation6], %s603_s27  ;;  %s982_s8 = scalar_lea.sflag [#allocation3], %s119_s24 }
  0x1f   : > { %s129_s7 = sshll.u32 %s123_s6, 4  ;;  %p775_p5 = pneg %p968_p0  ;;  %s980_s7 = int_to_ptr.vmem [resolvable:$true] %s129_s7 }
  0x22   : > { %710 = dma.hbm_to_smem (!%p708_p6), %s1401_s0, 16, %s871_s28, [#allocation5]  }
  0x23   : > { %s978_s5 = scalar_lea.hbm %s1402_s1, %s604_s25  ;;  %s778_s19 = scalar_lea.hbm %s1402_s1, 2048 }
  0x24   : > { %s773_s14 = scalar_lea.hbm %s978_s5, 512  ;;  %p779_p8 = scmp.lt.s32.totalorder %s978_s5, %s1402_s1 }
  0x25   : > { %p774_p3 = scmp.ne.s32.totalorder %s978_s5, %s773_s14  ;;  %p780_p9 = scmp.lt.s32.totalorder %s778_s19, %s773_s14 }
  0x27   : > { %p776_p7 = pnand %p775_p5, %p774_p3  ;;  %p781_p10 = por %p780_p9, %p779_p8 }
  0x29   : > { %p777_p6 = pneg %p776_p7 }
  0x2b   : > { %p782_p1 = pnand %p781_p10, %p777_p6 }
  0x2d   : > { %785 = shalt.err (!%p782_p1)
}
  0x2e   : > { %s786_s24 = scalar_lea.vmem %s980_s7, 512  ;;  %s872_s27 = smov [#allocation6]  }
  0x2f   : > { %p787_p2 = scmp.ne.s32.totalorder %s980_s7, %s786_s24  ;;  %s791_s29 = sshll.u32 %s872_s27, 4  ;;  %s792_s29 = int_to_ptr.vmem [resolvable:$false] %s791_s29 }
  0x30   : > { %s793_s30 = scalar_lea.vmem %s792_s29, 1024  ;;  %p794_p7 = scmp.lt.s32.totalorder %s980_s7, %s792_s29 }
  0x31   : > { %p789_p4 = pnand %p787_p2, %p775_p5  ;;  %p795_p12 = scmp.lt.s32.totalorder %s793_s30, %s786_s24 }
  0x33   : > { %p790_p3 = pneg %p789_p4  ;;  %p796_p11 = por %p795_p12, %p794_p7 }
  0x35   : > { %p797_p13 = pnand %p796_p11, %p790_p3 }
  0x37   : > { %800 = shalt.err (!%p797_p13)
}
  0x38   : > { %s873_s3 = smov 512   ;;  %s874_s4 = smov 128  }
  0x39   : > { %s875_s6 = smov 8   ;;  %p1403_p4 = scmp.ne.s32.totalorder %s1399_s23, 0 }
  0x3a   : > { %714 = dma.hbm_to_vmem [thread:$0]  (!%p968_p0), %s978_s5, 512, %s980_s7, %s982_s8, %s873_s3, %s874_s4, %s875_s6  }
  0x3b   : > { %141 = sbr.rel (%p1403_p4) target bundleno = 188 (0xbc), region = 28  ;;  %p1404_p5 = scmp.eq.s32.totalorder (!%p1403_p4), %s916_s13, 0 }
  0x40   : > { %844 = dma.done.wait (%p1404_p5), [#allocation5], 16   ;;  %p1405_p6 = pmov %p1404_p5 }
  0x41   : > { %s1010_s14 = sand.u32 1, %s861_s10   ;;  %p1406_p11 = scmp.ne.s32.totalorder %s1396_s20, 0 }
  0x42   : > { %846 = vsyncadd (%p1405_p6), [#allocation5], 4294967280  ;;  %s607_s16 = sshll.u32 %s1010_s14, 5  ;;  %s148_s17 = scalar_lea.sflag [#allocation3], %s1010_s14 }
  0x43   : > { %s1014_s19 = scalar_lea.vmem [#allocation6], %s607_s16 }
  0x44   : > { %848 = dma.done.wait (%p1406_p11), %s148_s17, 512  }
  0x45   : > { %850 = vsyncadd (%p1406_p11), %s148_s17, 4294966784 }
  0x46   : > { %156 = sfence }
  0x47   : > { %s180_s23 = sld [smem:[#allocation2]]  ;;  %v1049_v0 = vld [vmem:[%s1014_s19] sm:$0xff]  ;;  %v1052_v1 = vld [vmem:[%s1014_s19 + $0x8] sm:$0xff]  ;;  %v1065_v8 = vld [vmem:[%s1014_s19 + $0x10] sm:$0xff]  ;;  %p1407_p13 = scmp.ne.s32.totalorder %s1397_s21, 0 }
  0x48   : > { %s611_s26 = sld [smem:[#allocation2 + $0xa]]  ;;  %v1083_v17 = vld [vmem:[%s1014_s19 + $0x18] sm:$0xff] }
  0x49   : > { %s1020_s5 = sld [smem:[#allocation2 + $0x14]] }
  0x4a   : > { %s1022_s7 = sld [smem:[#allocation2 + $0x1e]] }
  0x4b   : > { %s1024_s8 = sld [smem:[#allocation2 + $0x28]] }
  0x4c   : > { %s615_s25 = sld [smem:[#allocation2 + $0x1]] }
  0x4d   : > { %s616_s28 = sld [smem:[#allocation2 + $0xb]]  ;;  %v181_v2 = vstv %s180_s23 }
  0x4e   : > { %s1026_s24 = sld [smem:[#allocation2 + $0x15]]  ;;  %v184_v3 = vstv %s611_s26  ;;  %v182_v6 = vmul.f32 %v181_v2, %v1049_v0 }
  0x4f   : > { %s1028_s27 = sld [smem:[#allocation2 + $0x1f]]  ;;  %v185_v7 = vmul.f32 %v1052_v1, %v184_v3  ;;  %v188_v9 = vstv %s1020_s5 }
  0x50   : > { %s1030_s29 = sld [smem:[#allocation2 + $0x29]]  ;;  %v189_v16 = vmul.f32 %v1065_v8, %v188_v9  ;;  %v192_v18 = vstv %s1022_s7 }
  0x51   : > { %s1032_s20 = sld [smem:[#allocation2 + $0x2]]  ;;  %v186_v15 = vadd.f32 %v185_v7, %v182_v6  ;;  %v193_v26 = vmul.f32 %v1083_v17, %v192_v18  ;;  %v196_v42 = vstv %s1024_s8 }
  0x52   : > { %s1034_s30 = sld [smem:[#allocation2 + $0xc]]  ;;  %v200_v4 = vstv %s615_s25 }
  0x53   : > { %s1036_s3 = sld [smem:[#allocation2 + $0x16]]  ;;  %v203_v5 = vstv %s616_s28  ;;  %v201_v10 = vmul.f32 %v200_v4, %v1049_v0  ;;  %v190_v25 = vadd.f32 %v189_v16, %v186_v15 }
  0x54   : > { %s1038_s4 = sld [smem:[#allocation2 + $0x20]]  ;;  %v204_v11 = vmul.f32 %v1052_v1, %v203_v5  ;;  %v207_v12 = vstv %s1026_s24 }
  0x55   : > { %s1040_s6 = sld [smem:[#allocation2 + $0x2a]]  ;;  %v208_v20 = vmul.f32 %v1065_v8, %v207_v12  ;;  %v211_v21 = vstv %s1028_s27  ;;  %v194_v38 = vadd.f32 %v193_v26, %v190_v25 }
  0x56   : > { %s1042_s16 = sld [smem:[#allocation2 + $0x3]]  ;;  %v205_v19 = vadd.f32 %v204_v11, %v201_v10  ;;  %v212_v30 = vmul.f32 %v1083_v17, %v211_v21  ;;  %v215_v43 = vstv %s1030_s29 }
  0x57   : > { %s1044_s17 = sld [smem:[#allocation2 + $0xd]]  ;;  %v219_v13 = vstv %s1032_s20  ;;  %v197_v54 = vadd.f32 %v196_v42, %v194_v38 }
  0x58   : > { %s1046_s0 = sld [smem:[#allocation2 + $0x17]]  ;;  %v222_v14 = vstv %s1034_s30  ;;  %v220_v22 = vmul.f32 %v219_v13, %v1049_v0  ;;  %v209_v29 = vadd.f32 %v208_v20, %v205_v19 }
  0x59   : > { %s1054_s1 = sld [smem:[#allocation2 + $0x21]]  ;;  %v223_v23 = vmul.f32 %v1052_v1, %v222_v14  ;;  %v226_v24 = vstv %s1036_s3  ;;  %v1163_v16 = vmax.f32 %v197_v54, 0.0 }
  0x5a   : > { %s1056_s18 = sld [smem:[#allocation2 + $0x2b]]  ;;  %v227_v32 = vmul.f32 %v1065_v8, %v226_v24  ;;  %v230_v35 = vstv %s1038_s4  ;;  %v213_v46 = vadd.f32 %v212_v30, %v209_v29 }
  0x5b   : > { %s1058_s11 = sld [smem:[#allocation2 + $0x4]]  ;;  %v224_v31 = vadd.f32 %v223_v23, %v220_v22  ;;  %v231_v48 = vmul.f32 %v1083_v17, %v230_v35  ;;  %v234_v63 = vstv %s1040_s6 }
  0x5c   : > { %s1062_s10 = sld [smem:[#allocation2 + $0xe]]  ;;  %v238_v27 = vstv %s1042_s16  ;;  %v216_v61 = vadd.f32 %v215_v43, %v213_v46 }
  0x5d   : > { %s1070_s23 = sld [smem:[#allocation2 + $0x18]]  ;;  %v241_v28 = vstv %s1044_s17  ;;  %v239_v36 = vmul.f32 %v238_v27, %v1049_v0  ;;  %v228_v47 = vadd.f32 %v227_v32, %v224_v31 }
  0x5e   : > { %s1073_s26 = sld [smem:[#allocation2 + $0x22]]  ;;  %v242_v37 = vmul.f32 %v1052_v1, %v241_v28  ;;  %v245_v39 = vstv %s1046_s0  ;;  %v1169_v20 = vmax.f32 %v216_v61, 0.0 }
  0x5f   : > { %s1077_s25 = sld [smem:[#allocation2 + $0x2c]]  ;;  %v246_v51 = vmul.f32 %v1065_v8, %v245_v39  ;;  %v249_v55 = vstv %s1054_s1  ;;  %v232_v62 = vadd.f32 %v231_v48, %v228_v47 }
  0x60   : > { %s1080_s5 = sld [smem:[#allocation2 + $0x5]]  ;;  %v243_v50 = vadd.f32 %v242_v37, %v239_v36  ;;  %v250_v4 = vmul.f32 %v1083_v17, %v249_v55  ;;  %v253_v25 = vstv %s1056_s18 }
  0x61   : > { %s1087_s28 = sld [smem:[#allocation2 + $0xf]]  ;;  %v257_v33 = vstv %s1058_s11  ;;  %v235_v24 = vadd.f32 %v234_v63, %v232_v62 }
  0x62   : > { %s1092_s24 = sld [smem:[#allocation2 + $0x19]]  ;;  %v260_v34 = vstv %s1062_s10  ;;  %v258_v44 = vmul.f32 %v257_v33, %v1049_v0  ;;  %v247_v3 = vadd.f32 %v246_v51, %v243_v50 }
  0x63   : > { %s1095_s20 = sld [smem:[#allocation2 + $0x23]]  ;;  %v261_v45 = vmul.f32 %v1052_v1, %v260_v34  ;;  %v264_v49 = vstv %s1070_s23 }
  0x64   : > { %s1100_s19 = sld [smem:[#allocation2 + $0x2d]]  ;;  %v265_v58 = vmul.f32 %v1065_v8, %v264_v49  ;;  %v268_v2 = vstv %s1073_s26  ;;  %v251_v28 = vadd.f32 %v250_v4, %v247_v3 }
  0x65   : > { %s1103_s7 = sld [smem:[#allocation2 + $0x6]]  ;;  %v262_v57 = vadd.f32 %v261_v45, %v258_v44  ;;  %v269_v13 = vmul.f32 %v1083_v17, %v268_v2  ;;  %v1198_v44 = vmax.f32 %v235_v24, 0.0 }
  0x66   : > { %s1108_s27 = sld [smem:[#allocation2 + $0x10]]  ;;  %v276_v40 = vstv %s1080_s5  ;;  %v254_v45 = vadd.f32 %v253_v25, %v251_v28 }
  0x67   : > { %s1113_s30 = sld [smem:[#allocation2 + $0x1a]]  ;;  %v279_v41 = vstv %s1087_s28  ;;  %v277_v52 = vmul.f32 %v276_v40, %v1049_v0  ;;  %v266_v12 = vadd.f32 %v265_v58, %v262_v57  ;;  %v272_v40 = vstv %s1077_s25 }
  0x68   : > { %s1118_s3 = sld [smem:[#allocation2 + $0x24]]  ;;  %v280_v53 = vmul.f32 %v1052_v1, %v279_v41  ;;  %v283_v56 = vstv %s1092_s24 }
  0x69   : > { %s1124_s10 = sld [smem:[#allocation2 + $0x2e]]  ;;  %v284_v6 = vmul.f32 %v1065_v8, %v283_v56  ;;  %v287_v7 = vstv %s1095_s20  ;;  %v270_v29 = vadd.f32 %v269_v13, %v266_v12 }
  0x6a   : > { %s1128_s0 = sld [smem:[#allocation2 + $0x7]]  ;;  %v281_v5 = vadd.f32 %v280_v53, %v277_v52  ;;  %v288_v22 = vmul.f32 %v1083_v17, %v287_v7  ;;  %v291_v41 = vstv %s1100_s19 }
  0x6b   : > { %s1133_s11 = sld [smem:[#allocation2 + $0x11]]  ;;  %v295_v59 = vstv %s1103_s7  ;;  %v273_v52 = vadd.f32 %v272_v40, %v270_v29 }
  0x6c   : > { %s1137_s8 = sld [smem:[#allocation2 + $0x1b]]  ;;  %v298_v60 = vstv %s1108_s27  ;;  %v296_v9 = vmul.f32 %v295_v59, %v1049_v0  ;;  %v285_v21 = vadd.f32 %v284_v6, %v281_v5 }
  0x6d   : > { %s1142_s29 = sld [smem:[#allocation2 + $0x25]]  ;;  %v299_v10 = vmul.f32 %v1052_v1, %v298_v60  ;;  %v302_v14 = vstv %s1113_s30  ;;  %v1227_v4 = vmax.f32 %v273_v52, 0.0 }
  0x6e   : > { %s1146_s4 = sld [smem:[#allocation2 + $0x2f]]  ;;  %v303_v27 = vmul.f32 %v1065_v8, %v302_v14  ;;  %v306_v30 = vstv %s1118_s3  ;;  %v289_v36 = vadd.f32 %v288_v22, %v285_v21 }
  0x6f   : > { %s1150_s1 = sld [smem:[#allocation2 + $0x8]]  ;;  %v300_v26 = vadd.f32 %v299_v10, %v296_v9  ;;  %v307_v43 = vmul.f32 %v1083_v17, %v306_v30  ;;  %v310_v57 = vstv %s1124_s10 }
  0x70   : > { %v314_v11 = vstv %s1128_s0  ;;  %s1156_s6 = sld [smem:[#allocation2 + $0x12]]  ;;  %v292_v53 = vadd.f32 %v291_v41, %v289_v36 }
  0x71   : > { %v317_v15 = vstv %s1133_s11  ;;  %s1161_s16 = sld [smem:[#allocation2 + $0x1c]]  ;;  %v315_v18 = vmul.f32 %v314_v11, %v1049_v0  ;;  %v304_v42 = vadd.f32 %v303_v27, %v300_v26 }
  0x72   : > { %v318_v19 = vmul.f32 %v1052_v1, %v317_v15  ;;  %s1167_s17 = sld [smem:[#allocation2 + $0x26]]  ;;  %v321_v23 = vstv %s1137_s8  ;;  %v1229_v5 = vmax.f32 %v292_v53, 0.0 }
  0x73   : > { %s1173_s23 = sld [smem:[#allocation2 + $0x30]]  ;;  %v322_v33 = vmul.f32 %v1065_v8, %v321_v23  ;;  %v325_v37 = vstv %s1142_s29  ;;  %v308_v56 = vadd.f32 %v307_v43, %v304_v42 }
  0x74   : > { %s1177_s26 = sld [smem:[#allocation2 + $0x9]]  ;;  %v319_v32 = vadd.f32 %v318_v19, %v315_v18  ;;  %v326_v49 = vmul.f32 %v1083_v17, %v325_v37  ;;  %v329_v6 = vstv %s1146_s4 }
  0x75   : > { %v333_v31 = vstv %s1150_s1  ;;  %s1181_s5 = sld [smem:[#allocation2 + $0x13]]  ;;  %v311_v7 = vadd.f32 %v310_v57, %v308_v56 }
  0x76   : > { %v334_v34 = vmul.f32 %v333_v31, %v1049_v0  ;;  %v336_v35 = vstv %s1156_s6  ;;  %s1186_s18 = sld [smem:[#allocation2 + $0x1d]]  ;;  %v323_v48 = vadd.f32 %v322_v33, %v319_v32 }
  0x77   : > { %v337_v38 = vmul.f32 %v1052_v1, %v336_v35  ;;  %v340_v39 = vstv %s1161_s16  ;;  %s1191_s28 = sld [smem:[#allocation2 + $0x27]]  ;;  %v1254_v27 = vmax.f32 %v311_v7, 0.0 }
  0x78   : > { %s1196_s24 = sld [smem:[#allocation2 + $0x31]]  ;;  %v341_v47 = vmul.f32 %v1065_v8, %v340_v39  ;;  %v344_v50 = vstv %s1167_s17  ;;  %v327_v2 = vadd.f32 %v326_v49, %v323_v48 }
  0x79   : > { %v338_v46 = vadd.f32 %v337_v38, %v334_v34  ;;  %s1201_s20 = sld [smem:[#allocation2 + $0x32]]  ;;  %v345_v61 = vmul.f32 %v1083_v17, %v344_v50  ;;  %v348_v12 = vstv %s1173_s23 }
  0x7a   : > { %v352_v51 = vstv %s1177_s26  ;;  %s1206_s25 = sld [smem:[#allocation2 + $0x35]]  ;;  %v330_v15 = vadd.f32 %v329_v6, %v327_v2 }
  0x7b   : > { %v353_v54 = vmul.f32 %v352_v51, %v1049_v0  ;;  %v355_v55 = vstv %s1181_s5  ;;  %s1210_s19 = sld [smem:[#allocation2 + $0x38]]  ;;  %v342_v60 = vadd.f32 %v341_v47, %v338_v46  ;;  %v1222_v0 = vmax.f32 %v254_v45, 0.0 }
  0x7c   : > { %v356_v58 = vmul.f32 %v1052_v1, %v355_v55  ;;  %v359_v59 = vstv %s1186_s18  ;;  %s1215_s7 = sld [smem:[#allocation2 + $0x3b]]  ;;  %v1258_v33 = vmax.f32 %v330_v15, 0.0 }
  0x7d   : > { %v360_v62 = vmul.f32 %v1065_v8, %v359_v59  ;;  %v363_v63 = vstv %s1191_s28  ;;  %s1220_s27 = sld [smem:[#allocation2 + $0x3e]] }
  0x7e   : > { %v357_v3 = vadd.f32 %v356_v58, %v353_v54  ;;  %v364_v1 = vmul.f32 %v1083_v17, %v363_v63  ;;  %s1225_s30 = sld [smem:[#allocation2 + $0x41]]  ;;  %v346_v17 = vadd.f32 %v345_v61, %v342_v60  ;;  %v367_v22 = vstv %s1196_s24 }
  0x7f   : > { %v371_v8 = vstv %s1201_s20  ;;  %s1233_s3 = sld [smem:[#allocation2 + $0x44]]  ;;  %s698_s20 = smul.u32 24, %s1010_s14 }
  0x80   : > { %v361_v9 = vadd.f32 %v360_v62, %v357_v3  ;;  %v372_v10 = vmul.f32 %v371_v8, %v1163_v16  ;;  %v374_v11 = vstv %s1206_s25  ;;  %s1237_s10 = sld [smem:[#allocation2 + $0x47]]  ;;  %v349_v28 = vadd.f32 %v348_v12, %v346_v17 }
  0x81   : > { %v375_v13 = vmul.f32 %v374_v11, %v1169_v20  ;;  %v378_v14 = vstv %s1210_s19  ;;  %s1242_s0 = sld [smem:[#allocation2 + $0x4a]] }
  0x82   : > { %v365_v18 = vadd.f32 %v364_v1, %v361_v9  ;;  %v379_v19 = vmul.f32 %v378_v14, %v1198_v44  ;;  %v382_v21 = vstv %s1215_s7  ;;  %s1246_s11 = sld [smem:[#allocation2 + $0x4d]]  ;;  %v1264_v37 = vmax.f32 %v349_v28, 0.0 }
  0x83   : > { %v376_v23 = vadd.f32 %v375_v13, %v372_v10  ;;  %v383_v24 = vmul.f32 %v382_v21, %v1222_v0  ;;  %v386_v25 = vstv %s1220_s27  ;;  %s1251_s8 = sld [smem:[#allocation2 + $0x50]] }
  0x84   : > { %v390_v26 = vstv %s1225_s30  ;;  %s671_s29 = sld [smem:[#allocation2 + $0x33]]  ;;  %v387_v30 = vmul.f32 %v386_v25, %v1227_v4  ;;  %v368_v31 = vadd.f32 %v367_v22, %v365_v18 }
  0x85   : > { %v380_v29 = vadd.f32 %v379_v19, %v376_v23  ;;  %s672_s4 = sld [smem:[#allocation2 + $0x36]]  ;;  %v394_v32 = vstv %s1233_s3  ;;  %v391_v35 = vmul.f32 %v390_v26, %v1229_v5 }
  0x86   : > { %s673_s1 = sld [smem:[#allocation2 + $0x39]]  ;;  %v398_v36 = vstv %s1237_s10  ;;  %v395_v39 = vmul.f32 %v394_v32, %v1254_v27  ;;  %v1269_v40 = vmax.f32 %v368_v31, 0.0 }
  0x87   : > { %v384_v34 = vadd.f32 %v383_v24, %v380_v29  ;;  %s674_s6 = sld [smem:[#allocation2 + $0x3c]]  ;;  %v402_v41 = vstv %s1242_s0  ;;  %v399_v45 = vmul.f32 %v398_v36, %v1258_v33  ;;  %s1310_s0 = scalar_lea.vmem [#allocation7], %s698_s20 }
  0x88   : > { %s1262_s16 = sld [smem:[#allocation2 + $0x3f]]  ;;  %v406_v48 = vstv %s1246_s11  ;;  %v403_v52 = vmul.f32 %v402_v41, %v1264_v37 }
  0x89   : > { %v388_v38 = vadd.f32 %v387_v30, %v384_v34  ;;  %s1267_s17 = sld [smem:[#allocation2 + $0x42]]  ;;  %v407_v59 = vmul.f32 %v406_v48, %v1269_v40  ;;  %v410_v3 = vstv %s1251_s8 }
  0x8a   : > { %v414_v42 = vstv %s671_s29  ;;  %s1272_s23 = sld [smem:[#allocation2 + $0x45]] }
  0x8b   : > { %v392_v43 = vadd.f32 %v391_v35, %v388_v38  ;;  %v415_v46 = vmul.f32 %v414_v42, %v1163_v16  ;;  %v417_v47 = vstv %s672_s4  ;;  %s1276_s26 = sld [smem:[#allocation2 + $0x48]]  ;;  %s695_s4 = sshll.u32 %s916_s13, 7 }
  0x8c   : > { %v418_v49 = vmul.f32 %v417_v47, %v1169_v20  ;;  %v421_v50 = vstv %s673_s1  ;;  %s1280_s5 = sld [smem:[#allocation2 + $0x4b]]  ;;  %s514_s1 = sshll.u32 %s1310_s0, 4  ;;  %s1338_s1 = int_to_ptr.vmem [resolvable:$true] %s514_s1 }
  0x8d   : > { %v396_v51 = vadd.f32 %v395_v39, %v392_v43  ;;  %v422_v53 = vmul.f32 %v421_v50, %v1198_v44  ;;  %v425_v54 = vstv %s674_s6  ;;  %s1284_s18 = sld [smem:[#allocation2 + $0x4e]]  ;;  %s876_s13 = smov [#allocation7]  }
  0x8e   : > { %v419_v55 = vadd.f32 %v418_v49, %v415_v46  ;;  %v426_v56 = vmul.f32 %v425_v54, %v1222_v0  ;;  %v429_v57 = vstv %s1262_s16  ;;  %s1288_s28 = sld [smem:[#allocation2 + $0x51]] }
  0x8f   : > { %v400_v58 = vadd.f32 %v399_v45, %v396_v51  ;;  %v433_v60 = vstv %s1267_s17  ;;  %s683_s24 = sld [smem:[#allocation2 + $0x34]]  ;;  %v430_v62 = vmul.f32 %v429_v57, %v1227_v4  ;;  %s1336_s17 = scalar_lea.hbm %s1383_s2, %s695_s4 }
  0x90   : > { %v423_v61 = vadd.f32 %v422_v53, %v419_v55  ;;  %s684_s25 = sld [smem:[#allocation2 + $0x37]]  ;;  %v437_v2 = vstv %s1272_s23  ;;  %v434_v6 = vmul.f32 %v433_v60, %v1229_v5  ;;  %s502_s23 = scalar_lea.sflag [#allocation4], %s1010_s14 }
  0x91   : > { %v404_v63 = vadd.f32 %v403_v52, %v400_v58  ;;  %s685_s19 = sld [smem:[#allocation2 + $0x3a]]  ;;  %v441_v7 = vstv %s1276_s26  ;;  %v438_v10 = vmul.f32 %v437_v2, %v1254_v27  ;;  %s801_s26 = scalar_lea.vmem %s1338_s1, 384 }
  0x92   : > { %v427_v1 = vadd.f32 %v426_v56, %v423_v61  ;;  %s686_s7 = sld [smem:[#allocation2 + $0x3d]]  ;;  %v445_v17 = vstv %s1280_s5  ;;  %v442_v14 = vmul.f32 %v441_v7, %v1258_v33  ;;  %p802_p12 = scmp.ne.s32.totalorder %s1338_s1, %s801_s26 }
  0x93   : > { %v408_v8 = vadd.f32 %v407_v59, %v404_v63  ;;  %s1298_s27 = sld [smem:[#allocation2 + $0x40]]  ;;  %v449_v19 = vstv %s1284_s18  ;;  %v446_v24 = vmul.f32 %v445_v17, %v1264_v37  ;;  %s805_s5 = sshll.u32 %s876_s13, 4  ;;  %s806_s5 = int_to_ptr.vmem [resolvable:$false] %s805_s5 }
  0x94   : > { %v431_v9 = vadd.f32 %v430_v62, %v427_v1  ;;  %s1301_s30 = sld [smem:[#allocation2 + $0x43]]  ;;  %v450_v31 = vmul.f32 %v449_v19, %v1269_v40  ;;  %v453_v38 = vstv %s1288_s28  ;;  %p803_p0 = pnand %p802_p12, %p1407_p13 }
  0x95   : > { %v411_v11 = vadd.f32 %v410_v3, %v408_v8  ;;  %v458_v12 = vstv %s683_s24  ;;  %s1304_s3 = sld [smem:[#allocation2 + $0x46]]  ;;  %s807_s18 = scalar_lea.vmem %s806_s5, 768 }
  0x96   : > { %v435_v13 = vadd.f32 %v434_v6, %v431_v9  ;;  %v459_v15 = vmul.f32 %v458_v12, %v1163_v16  ;;  %v461_v18 = vstv %s684_s25  ;;  %s1308_s10 = sld [smem:[#allocation2 + $0x49]]  ;;  %p804_p8 = pneg %p803_p0 }
  0x97   : > { %412 = vst [vmem:[%s1310_s0] sm:$0xff] %v411_v11  ;;  %v462_v21 = vmul.f32 %v461_v18, %v1169_v20  ;;  %v465_v22 = vstv %s685_s19  ;;  %s691_s11 = sld [smem:[#allocation2 + $0x4c]]  ;;  %p808_p9 = scmp.lt.s32.totalorder %s1338_s1, %s806_s5 }
  0x98   : > { %v439_v23 = vadd.f32 %v438_v10, %v435_v13  ;;  %v466_v25 = vmul.f32 %v465_v22, %v1198_v44  ;;  %v469_v16 = vstv %s686_s7  ;;  %s692_s8 = sld [smem:[#allocation2 + $0x4f]]  ;;  %p809_p10 = scmp.lt.s32.totalorder %s807_s18, %s801_s26 }
  0x99   : > { %v463_v26 = vadd.f32 %v462_v21, %v459_v15  ;;  %v470_v28 = vmul.f32 %v469_v16, %v1222_v0  ;;  %v473_v29 = vstv %s1298_s27  ;;  %s693_s29 = sld [smem:[#allocation2 + $0x52]] }
  0x9a   : > { %v443_v30 = vadd.f32 %v442_v14, %v439_v23  ;;  %v477_v32 = vstv %s1301_s30  ;;  %v474_v34 = vmul.f32 %v473_v29, %v1227_v4  ;;  %p810_p1 = por %p809_p10, %p808_p9 }
  0x9b   : > { %v467_v20 = vadd.f32 %v466_v25, %v463_v26  ;;  %v481_v36 = vstv %s1304_s3  ;;  %v478_v39 = vmul.f32 %v477_v32, %v1229_v5 }
  0x9c   : > { %v447_v35 = vadd.f32 %v446_v24, %v443_v30  ;;  %v485_v42 = vstv %s1308_s10  ;;  %v482_v43 = vmul.f32 %v481_v36, %v1254_v27  ;;  %p811_p2 = pnand %p810_p1, %p804_p8 }
  0x9d   : > { %v471_v44 = vadd.f32 %v470_v28, %v467_v20  ;;  %v489_v46 = vstv %s691_s11  ;;  %v486_v4 = vmul.f32 %v485_v42, %v1258_v33 }
  0x9e   : > { %v451_v41 = vadd.f32 %v450_v31, %v447_v35  ;;  %v493_v48 = vstv %s692_s8  ;;  %v490_v5 = vmul.f32 %v489_v46, %v1264_v37 }
  0x9f   : > { %v475_v0 = vadd.f32 %v474_v34, %v471_v44  ;;  %v494_v51 = vmul.f32 %v493_v48, %v1269_v40  ;;  %v497_v27 = vstv %s693_s29 }
  0xa0   : > { %v454_v45 = vadd.f32 %v453_v38, %v451_v41 }
  0xa1   : > { %v479_v47 = vadd.f32 %v478_v39, %v475_v0 }
  0xa2   : > { %682 = vst [vmem:[%s1310_s0 + $0x8] sm:$0xff] %v454_v45 }
  0xa3   : > { %v483_v49 = vadd.f32 %v482_v43, %v479_v47 }
  0xa5   : > { %v487_v50 = vadd.f32 %v486_v4, %v483_v49 }
  0xa7   : > { %v491_v52 = vadd.f32 %v490_v5, %v487_v50 }
  0xa9   : > { %v495_v53 = vadd.f32 %v494_v51, %v491_v52 }
  0xab   : > { %v498_v33 = vadd.f32 %v497_v27, %v495_v53 }
  0xad   : > { %694 = vst [vmem:[%s1310_s0 + $0x10] sm:$0xff] %v498_v33 }
  0xae   : > { %814 = shalt.err (!%p811_p2)
}
  0xaf   : > { %s815_s28 = scalar_lea.hbm %s1336_s17, 384  ;;  %s819_s25 = scalar_lea.hbm %s1383_s2, 1536 }
  0xb0   : > { %p816_p3 = scmp.ne.s32.totalorder %s1336_s17, %s815_s28  ;;  %p820_p5 = scmp.lt.s32.totalorder %s1336_s17, %s1383_s2 }
  0xb1   : > { %p821_p6 = scmp.lt.s32.totalorder %s819_s25, %s815_s28 }
  0xb2   : > { %p817_p7 = pnand %p816_p3, %p1407_p13 }
  0xb3   : > { %p822_p11 = por %p821_p6, %p820_p5 }
  0xb4   : > { %p818_p4 = pneg %p817_p7 }
  0xb6   : > { %p823_p12 = pnand %p822_p11, %p818_p4 }
  0xb8   : > { %826 = shalt.err (!%p823_p12)
}
  0xb9   : > { %s877_s27 = smov 128   ;;  %s878_s30 = smov 512  }
  0xba   : > { %s879_s3 = smov 8  }
  0xbb   : > { %705 = dma.vmem_to_hbm [thread:$0]  (%p1407_p13), %s1338_s1, 384, %s1336_s17, %s502_s23, %s877_s27, %s878_s30, %s879_s3  }
  0xbc PF: > { %p722_p0 = scmp.ge.s32.totalorder %s869_s12, 2  ;;  %s529_s10 = sand.u32 1, %s857_s9  }
  0xbd   : > { %p1408_p8 = scmp.ne.s32.totalorder %s1398_s22, 0  ;;  %s530_s0 = scalar_lea.sflag [#allocation4], %s529_s10 }
  0xbf   : > { %p716_p9 = pnand %p722_p0, %p1408_p8 }
  0xc1   : > { %p717_p10 = pneg %p716_p9 }
  0xc3   : > { %852 = dma.done.wait (%p717_p10), %s530_s0, 384  }
  0xc4   : > { %854 = vsyncadd (%p717_p10), %s530_s0, 4294966912  ;;  %s1409_s9 = sld [smem:[#allocation11_spill]]  ;;  %p16_p1 = scmp.ge.s32.totalorder %s920_s15, 6  }
  0xc5   : > { %s1410_s10 = sld [smem:[#allocation12_spill]]  ;;  %s1412_s12 = smov %s920_s15 }
  0xc6   : > { %s1411_s11 = sld [smem:[#allocation13_spill]]  ;;  %18 = sbr.rel (!%p16_p1) target bundleno = 9 (0x9), region = 83 }
  0xcb   :  { %535 = vsyncpa [#allocation3], 1 }
  0xcc   :  { %537 = vsyncpa [#allocation3 + $0x1], 1 }
  0xcd   :  { %538 = vsyncpa [#allocation4], 1 }
  0xce   :  { %540 = vsyncpa [#allocation4 + $0x1], 1 }
  0xcf   :  { %541 = vsyncpa [#allocation5], 1 }
  0xd0   :  { %543 = vsyncpa [#allocation5 + $0x1], 1 }

</bundles_post_ra>
